<compile_context>
chip_gen: v6e
topology: v6e:2x2x1
jax: 0.10.0
libtpu: 0.0.40
codegen_flags: <defaults>
</compile_context>

<pallas_src>
import functools

import jax
import jax.numpy as jnp
import numpy as np
from jax import lax
from jax.experimental import pallas as pl
from jax.experimental.pallas import tpu as pltpu


def _pick_batch_block(n):
    # Largest batch block that still leaves >= 2 grid steps (v7x has 2 TensorCores
    # sharing the "parallel" axis); larger blocks amortize per-step grid overhead.
    for nb in (8, 4, 2):
        if n % nb == 0 and n // nb >= 2:
            return nb
    return 1


def _flip_block_kernel(x_ref, w_ref, b_ref, m_ref, o_ref, xs_ref, *, wp, halo, nb):
    # x_ref : (nb, Ck, HW)   pooled, channel-folded input (H*Wp flattened onto lanes)
    # w_ref : (Cout, 9*Ck)   folded conv weights in im2col row order (kh, kw, c)
    # b_ref : (Cout, 1)
    # m_ref : (2, HWs)       f32 0/1 edge masks in scratch coords:
    #                          row 0 zeroes src col == wp-1 (feeds the dw=-1 taps)
    #                          row 1 zeroes src col == 0    (feeds the dw=+1 taps)
    # o_ref : (nb, Cout, HW) lane-dense output
    # xs_ref: (Ck, HWs)      VMEM scratch holding one halo'd image
    ck = x_ref.shape[1]
    hw = x_ref.shape[2]
    cout = o_ref.shape[1]
    hws = xs_ref.shape[1]

    # Hoisted per-grid-step constants (all tiny).
    w_mat = w_ref[...]
    bias = jnp.broadcast_to(b_ref[...], (cout, hw)).astype(jnp.float32)
    m_nr = jnp.broadcast_to(m_ref[0:1, :], (ck, hws))
    m_nl = jnp.broadcast_to(m_ref[1:2, :], (ck, hws))

    # Zero the whole scratch once per grid step; the per-image store only overwrites
    # the middle, so the SAME-conv row halo stays zero.  (Unconditional, so correct
    # under megacore grid splitting as well.)
    xs_ref[...] = jnp.zeros((ck, hws), jnp.float32)

    for n in range(nb):  # static unroll over the batch block
        xs_ref[:, halo:halo + hw] = x_ref[n]
        xs = xs_ref[...]
        x_nr = xs * m_nr          # sources usable by dw = -1 taps
        x_nl = xs * m_nl          # sources usable by dw = +1 taps

        taps = []
        for kh in range(3):
            base = halo + (kh - 1) * wp
            taps.append(x_nr[:, base - 1:base - 1 + hw])   # dw = -1
            taps.append(xs[:, base:base + hw])             # dw =  0
            taps.append(x_nl[:, base + 1:base + 1 + hw])   # dw = +1
        patches = jnp.concatenate(taps, axis=0)            # (9*Ck, HW), tile-aligned

        out = jnp.dot(w_mat, patches, preferred_element_type=jnp.float32) + bias
        o_ref[n] = out.astype(o_ref.dtype)


def feature_flip_block(x_nchw, w_hwio, bias):
    """x_nchw: (N, C, H, W) f32; w_hwio: (3, 3, 2C, Cout) HWIO; bias: (Cout,)."""
    N, C, H, W = x_nchw.shape
    assert W % 2 == 0, "AvgPool2d((1,2)) with even W assumed"
    wp = W // 2
    hw = H * wp
    cout = w_hwio.shape[-1]
    halo = wp + 1                       # flat halo covering the dh=+-1, dw=+-1 taps
    ck = -(-C // 8) * 8                 # channels padded to a full sublane tile
    hwp = -(-hw // 128) * 128           # lane-dense output (no-op when hw % 128 == 0)
    hws = hwp + 2 * halo

    # --- fold flip+concat into the weights; lay out for the single im2col matmul ----
    w_fold = w_hwio[:, :, :C, :] + w_hwio[:, :, ::-1, :][:, :, :C, :]    # (3,3,C,Cout)
    w_fold = jnp.pad(w_fold, ((0, 0), (0, 0), (0, ck - C), (0, 0)))      # (3,3,Ck,Cout)
    w_mat = jnp.transpose(w_fold, (3, 0, 1, 2)).reshape(cout, 9 * ck)    # (Cout,9*Ck)

    # --- AvgPool2d((1,2)) as one fused XLA pass; reshape/channel-pad are cheap -------
    pooled = (x_nchw[..., 0::2] + x_nchw[..., 1::2]) * 0.5               # (N,C,H,wp)
    x_flat = pooled.reshape(N, C, hw)
    x_flat = jnp.pad(x_flat, ((0, 0), (0, ck - C), (0, hwp - hw)))       # (N,Ck,hwp)

    # --- grid-invariant column-edge masks (host side, scratch coordinates) -----------
    col = (np.arange(hws) - halo) % wp
    masks = jnp.asarray(np.stack([(col != wp - 1), (col != 0)]).astype(np.float32))

    nb = _pick_batch_block(N)
    kernel = functools.partial(_flip_block_kernel, wp=wp, halo=halo, nb=nb)
    out_flat = pl.pallas_call(
        kernel,
        out_shape=jax.ShapeDtypeStruct((N, cout, hwp), x_nchw.dtype),
        grid_spec=pltpu.PrefetchScalarGridSpec(
            num_scalar_prefetch=0,
            grid=(N // nb,),
            in_specs=[
                pl.BlockSpec((nb, ck, hwp), lambda g: (g, 0, 0)),
                pl.BlockSpec((cout, 9 * ck), lambda g: (0, 0)),
                pl.BlockSpec((cout, 1), lambda g: (0, 0)),
                pl.BlockSpec((2, hws), lambda g: (0, 0)),
            ],
            out_specs=pl.BlockSpec((nb, cout, hwp), lambda g: (g, 0, 0)),
            scratch_shapes=[pltpu.VMEM((ck, hws), jnp.float32)],
        ),
        compiler_params=pltpu.CompilerParams(
            dimension_semantics=("parallel",)),
    )(x_flat, w_mat, bias.reshape(cout, 1), masks)

    # NCHW output is a crop (no-op here) + reshape of the lane-dense result.
    return out_flat[..., :hw].reshape(N, cout, H, wp)


def _reference(x_nchw, w_hwio, bias):
    # Pure-JAX reference mirroring the PyTorch forward (NCHW throughout).
    flipped = jnp.flip(x_nchw, axis=1)
    merged = jnp.concatenate([x_nchw, flipped], axis=1)        # (N, 2C, H, W)
    pooled = (merged[..., 0::2] + merged[..., 1::2]) * 0.5     # AvgPool2d((1,2))
    w_oihw = jnp.transpose(w_hwio, (3, 2, 0, 1))
    out = lax.conv_general_dilated(
        pooled, w_oihw, window_strides=(1, 1), padding=((1, 1), (1, 1)),
        dimension_numbers=("NCHW", "OIHW", "NCHW"))
    return out + bias[None, :, None, None]


if __name__ == "__main__":
    N, C, H, W = 2, 4, 16, 16        # batch=2, in_channels=4, spatial=16
    Cout = 8                         # out_channels=8, kernel_size=3

    key = jax.random.PRNGKey(0)
    kx, kw, kb = jax.random.split(key, 3)
    x = jax.random.normal(kx, (N, C, H, W), dtype=jnp.float32)
    # Conv2d(in=2C, out=Cout, k=3) parameters, deterministic synthetic init (HWIO).
    w = jax.random.normal(kw, (3, 3, 2 * C, Cout), dtype=jnp.float32) * 0.1
    b = jax.random.normal(kb, (Cout,), dtype=jnp.float32) * 0.1

    out = feature_flip_block(x, w, b)
    out = jax.block_until_ready(out)

    ref = _reference(x, w, b)
    assert out.shape == (N, Cout, H, W // 2), out.shape
    err = np.max(np.abs(np.asarray(out) - np.asarray(ref)))
    if not np.allclose(np.asarray(out), np.asarray(ref), atol=1e-4, rtol=1e-4):
        raise SystemExit(f"mismatch vs reference: max abs err = {err}")
    print("KERNEL_OK")
</pallas_src>

<mosaic_0001>
module attributes {stable_mosaic.version = 11 : i64} {
  func.func @_flip_block_kernel(%arg0: i32, %arg1: memref<1x8x128xf32, #tpu.memory_space<vmem>>, %arg2: memref<8x72xf32, #tpu.memory_space<vmem>>, %arg3: memref<8x1xf32, #tpu.memory_space<vmem>>, %arg4: memref<2x146xf32, #tpu.memory_space<vmem>>, %arg5: memref<1x8x128xf32, #tpu.memory_space<vmem>>, %arg6: memref<8x146xf32, #tpu.memory_space<vmem>>) attributes {dimension_semantics = [#tpu.dimension_semantics<parallel>], iteration_bounds = array<i64: 2>, scalar_prefetch = 0 : i64, scratch_operands = 1 : i64, tpu.core_type = #tpu.core_type<tc>, window_params = [{transform_indices = @transform_0, window_bounds = array<i64: 1, 8, 128>}, {pipeline_mode = #tpu.pipeline_mode<synchronous>, transform_indices = @transform_1, window_bounds = array<i64: 8, 72>}, {pipeline_mode = #tpu.pipeline_mode<synchronous>, transform_indices = @transform_2, window_bounds = array<i64: 8, 1>}, {pipeline_mode = #tpu.pipeline_mode<synchronous>, transform_indices = @transform_3, window_bounds = array<i64: 2, 146>}, {transform_indices = @transform_4, window_bounds = array<i64: 1, 8, 128>}]} {
    %c0 = arith.constant 0 : index
    %c0_0 = arith.constant 0 : index
    %0 = vector.load %arg2[%c0, %c0_0] : memref<8x72xf32, #tpu.memory_space<vmem>>, vector<8x72xf32>
    %c0_1 = arith.constant 0 : index
    %c0_2 = arith.constant 0 : index
    %1 = vector.load %arg3[%c0_1, %c0_2] : memref<8x1xf32, #tpu.memory_space<vmem>>, vector<8x1xf32>
    %2 = vector.shape_cast %1 : vector<8x1xf32> to vector<8x1xf32>
    %3 = vector.broadcast %2 : vector<8x1xf32> to vector<8x128xf32>
    %c0_3 = arith.constant 0 : index
    %c0_4 = arith.constant 0 : index
    %4 = vector.load %arg4[%c0_3, %c0_4] : memref<2x146xf32, #tpu.memory_space<vmem>>, vector<1x146xf32>
    %5 = vector.shape_cast %4 : vector<1x146xf32> to vector<1x146xf32>
    %6 = vector.broadcast %5 : vector<1x146xf32> to vector<8x146xf32>
    %c1 = arith.constant 1 : index
    %c0_5 = arith.constant 0 : index
    %7 = vector.load %arg4[%c1, %c0_5] : memref<2x146xf32, #tpu.memory_space<vmem>>, vector<1x146xf32>
    %8 = vector.shape_cast %7 : vector<1x146xf32> to vector<1x146xf32>
    %9 = vector.broadcast %8 : vector<1x146xf32> to vector<8x146xf32>
    %cst = arith.constant 0.000000e+00 : f32
    %10 = vector.broadcast %cst : f32 to vector<8x146xf32>
    %c0_6 = arith.constant 0 : index
    %c0_7 = arith.constant 0 : index
    %11 = vector.load %arg6[%c0_6, %c0_7] : memref<8x146xf32, #tpu.memory_space<vmem>>, vector<8x146xf32>
    tpu.vector_store %arg6[%c0_6, %c0_7], %10 {strides = array<i32>} : memref<8x146xf32, #tpu.memory_space<vmem>>, vector<8x146xf32>,
    %c0_8 = arith.constant 0 : index
    %c0_9 = arith.constant 0 : index
    %c0_10 = arith.constant 0 : index
    %12 = vector.load %arg1[%c0_8, %c0_9, %c0_10] : memref<1x8x128xf32, #tpu.memory_space<vmem>>, vector<1x8x128xf32>
    %13 = vector.shape_cast %12 : vector<1x8x128xf32> to vector<8x128xf32>
    %c0_11 = arith.constant 0 : index
    %c9 = arith.constant 9 : index
    %14 = vector.load %arg6[%c0_11, %c9] : memref<8x146xf32, #tpu.memory_space<vmem>>, vector<8x128xf32>
    tpu.vector_store %arg6[%c0_11, %c9], %13 {strides = array<i32>} : memref<8x146xf32, #tpu.memory_space<vmem>>, vector<8x128xf32>,
    %c0_12 = arith.constant 0 : index
    %c0_13 = arith.constant 0 : index
    %15 = vector.load %arg6[%c0_12, %c0_13] : memref<8x146xf32, #tpu.memory_space<vmem>>, vector<8x146xf32>
    %16 = arith.mulf %15, %6 : vector<8x146xf32>
    %17 = arith.mulf %15, %9 : vector<8x146xf32>
    %18 = vector.extract_strided_slice %16 {offsets = [0, 0], sizes = [8, 128], strides = [1, 1]} : vector<8x146xf32> to vector<8x128xf32>
    %19 = vector.extract_strided_slice %15 {offsets = [0, 1], sizes = [8, 128], strides = [1, 1]} : vector<8x146xf32> to vector<8x128xf32>
    %20 = vector.extract_strided_slice %17 {offsets = [0, 2], sizes = [8, 128], strides = [1, 1]} : vector<8x146xf32> to vector<8x128xf32>
    %21 = vector.extract_strided_slice %16 {offsets = [0, 8], sizes = [8, 128], strides = [1, 1]} : vector<8x146xf32> to vector<8x128xf32>
    %22 = vector.extract_strided_slice %15 {offsets = [0, 9], sizes = [8, 128], strides = [1, 1]} : vector<8x146xf32> to vector<8x128xf32>
    %23 = vector.extract_strided_slice %17 {offsets = [0, 10], sizes = [8, 128], strides = [1, 1]} : vector<8x146xf32> to vector<8x128xf32>
    %24 = vector.extract_strided_slice %16 {offsets = [0, 16], sizes = [8, 128], strides = [1, 1]} : vector<8x146xf32> to vector<8x128xf32>
    %25 = vector.extract_strided_slice %15 {offsets = [0, 17], sizes = [8, 128], strides = [1, 1]} : vector<8x146xf32> to vector<8x128xf32>
    %26 = vector.extract_strided_slice %17 {offsets = [0, 18], sizes = [8, 128], strides = [1, 1]} : vector<8x146xf32> to vector<8x128xf32>
    %27 = tpu.concatenate %18, %19, %20, %21, %22, %23, %24, %25, %26 in 0 : vector<8x128xf32>, vector<8x128xf32>, vector<8x128xf32>, vector<8x128xf32>, vector<8x128xf32>, vector<8x128xf32>, vector<8x128xf32>, vector<8x128xf32>, vector<8x128xf32> -> vector<72x128xf32>
    %cst_14 = arith.constant dense<0.000000e+00> : vector<8x128xf32>
    %28 = tpu.matmul %0, %27, %cst_14 {dimension_numbers = #tpu.dot_dimension_numbers<[1], [0], [0], [1], [0, 0, 1, 1], [], []>} : vector<8x72xf32>, vector<72x128xf32>, vector<8x128xf32> -> vector<8x128xf32>
    %29 = arith.addf %28, %3 : vector<8x128xf32>
    %c0_15 = arith.constant 0 : index
    %c0_16 = arith.constant 0 : index
    %c0_17 = arith.constant 0 : index
    %30 = vector.load %arg5[%c0_15, %c0_16, %c0_17] : memref<1x8x128xf32, #tpu.memory_space<vmem>>, vector<1x8x128xf32>
    %31 = vector.shape_cast %30 : vector<1x8x128xf32> to vector<8x128xf32>
    %32 = vector.shape_cast %29 : vector<8x128xf32> to vector<1x8x128xf32>
    tpu.vector_store %arg5[%c0_15, %c0_16, %c0_17], %32 {strides = array<i32>} : memref<1x8x128xf32, #tpu.memory_space<vmem>>, vector<1x8x128xf32>,
    return
  }
  func.func @transform_0(%arg0: i32) -> (i32, i32, i32) {
    %c0_i32 = arith.constant 0 : i32
    %c0_i32_0 = arith.constant 0 : i32
    %c0_i32_1 = arith.constant 0 : i32
    return %arg0, %c0_i32, %c0_i32_0 : i32, i32, i32
  }
  func.func @transform_1(%arg0: i32) -> (i32, i32) {
    %c0_i32 = arith.constant 0 : i32
    %c0_i32_0 = arith.constant 0 : i32
    %c0_i32_1 = arith.constant 0 : i32
    return %c0_i32, %c0_i32_0 : i32, i32
  }
  func.func @transform_2(%arg0: i32) -> (i32, i32) {
    %c0_i32 = arith.constant 0 : i32
    %c0_i32_0 = arith.constant 0 : i32
    %c0_i32_1 = arith.constant 0 : i32
    return %c0_i32, %c0_i32_0 : i32, i32
  }
  func.func @transform_3(%arg0: i32) -> (i32, i32) {
    %c0_i32 = arith.constant 0 : i32
    %c0_i32_0 = arith.constant 0 : i32
    %c0_i32_1 = arith.constant 0 : i32
    return %c0_i32, %c0_i32_0 : i32, i32
  }
  func.func @transform_4(%arg0: i32) -> (i32, i32, i32) {
    %c0_i32 = arith.constant 0 : i32
    %c0_i32_0 = arith.constant 0 : i32
    %c0_i32_1 = arith.constant 0 : i32
    return %arg0, %c0_i32, %c0_i32_0 : i32, i32, i32
  }
}

</mosaic_0001>

<bundles_post_ra>
// kernel: tpu_custom_call.1
= control target key start
LH: loop header
LB: loop body
LE: loop exit
PB: predicated region body
PF: predicated region fallthrough
CT: control target
= control target key end

     0   :  { %9 = vsyncpa [#allocation4], 0  ;;  %s902_s0 = inlined_call_operand.hbm [shape: f32[2,8,128], index: 0, kind: input, shape index: {}]   ;;  %s903_s1 = inlined_call_operand.vmem [shape: f32[8,72], index: 1, kind: input, shape index: {}]   ;;  %s904_s2 = inlined_call_operand.vmem [shape: f32[8,1], index: 2, kind: input, shape index: {}]   ;;  %s905_s3 = inlined_call_operand.vmem [shape: f32[2,146], index: 3, kind: input, shape index: {}]   ;;  %s906_s4 = inlined_call_operand.hbm [shape: f32[2,8,128], index: 4, kind: output, shape index: {}]  }
   0x1   :  { %11 = vsyncpa [#allocation4 + $0x1], 0 }
   0x2   :  { %12 = vsyncpa [#allocation5], 0 }
   0x3   :  { %14 = vsyncpa [#allocation5 + $0x1], 0  ;;  %s722_s15 = smov 0   ;;  %s724_s16 = smov 0  }
   0x4   :  { %s726_s17 = smov 0   ;;  %s728_s18 = smov 0  }
   0x5 LB: > { %s743_s19 = sadd.s32 4294967295, %s681_s18   ;;  %s484_s20 = sadd.s32 4294967294, %s681_s18   ;;  %s681_s18 = sphi %s728_s18, %s923_s18   ;;  %s677_s17 = sphi %s726_s17, %s922_s17   ;;  %s673_s16 = sphi %s724_s16, %s921_s16   ;;  %s669_s15 = sphi %s722_s15, %s920_s15  }
   0x6   : > { %s747_s21 = sadd.s32 1, %s681_s18   ;;  %s27_s22 = sadd.s32 1, %s677_s17 }
   0x7   : > { %s24_s23 = ssub.s32 %s681_s18, %s747_s21  ;;  %p34_p0 = scmp.ne.s32.totalorder %s677_s17, %s673_s16 }
   0x8   : > { %p25_p1 = scmp.eq.s32.totalorder %s24_s23, 0  ;;  %p35_p2 = scmp.eq.s32.totalorder %s681_s18, 0 }
   0x9   : > { %p40_p3 = scmp.ne.s32.totalorder %s673_s16, %s669_s15  ;;  %p41_p4 = scmp.eq.s32.totalorder %s743_s19, 0 }
   0xa   : > { %s759_s24 = scalar_select %p25_p1, %s677_s17, %s27_s22  }
   0xb   : > { %p761_p5 = por %p35_p2, %p34_p0  ;;  %p765_p6 = por %p41_p4, %p40_p3 }
   0xc   : > { %p127_p7 = scmp.eq.s32.totalorder %s743_s19, 1  ;;  %p133_p8 = scmp.eq.s32.totalorder %s484_s20, 1 }
   0xd   : > { %s910_s26 = scalar_select %p765_p6, 1, 0 }
   0xe   : > { %p541_p10 = scmp.lt.s32.totalorder %s681_s18, 2  ;;  %p772_p11 = por %p127_p7, %p34_p0 }
   0xf   : > { %p776_p12 = por %p133_p8, %p40_p3  ;;  %s162_s29 = sand.u32 1, %s677_s17  }
  0x10   : > { %s911_s27 = scalar_select %p772_p11, 1, 0 }
  0x11   : > { %s912_s28 = scalar_select %p776_p12, 1, 0 }
  0x12   : > { %s488_s30 = sshll.u32 %s681_s18, 7  ;;  %s487_s5 = sshll.u32 %s162_s29, 3 }
  0x13   : > { %s785_s8 = scalar_lea.hbm %s902_s0, %s488_s30  ;;  %s166_s9 = scalar_lea.vmem [#allocation3], %s487_s5 }
  0x14   : > { %s173_s10 = sshll.u32 %s166_s9, 4  ;;  %p789_p13 = pnand %p541_p10, %p761_p5  ;;  %s793_s10 = int_to_ptr.vmem [resolvable:$true] %s173_s10 }
  0x15   : > { %s163_s12 = scalar_lea.sflag [#allocation4], %s162_s29  ;;  %s589_s13 = scalar_lea.hbm %s785_s8, 128 }
  0x16   : > { %p590_p2 = scmp.ne.s32.totalorder %s785_s8, %s589_s13  ;;  %p591_p3 = pneg %p789_p13 }
  0x17   : > { %s594_s22 = scalar_lea.hbm %s902_s0, 256  ;;  %p595_p5 = scmp.lt.s32.totalorder %s785_s8, %s902_s0 }
  0x18   : > { %p592_p4 = pnand %p591_p3, %p590_p2  ;;  %p596_p8 = scmp.lt.s32.totalorder %s594_s22, %s589_s13 }
  0x1a   : > { %p593_p7 = pneg %p592_p4  ;;  %p597_p10 = por %p596_p8, %p595_p5 }
  0x1c   : > { %p598_p9 = pnand %p597_p10, %p593_p7 }
  0x1e   : > { %601 = shalt.err (!%p598_p9)
}
  0x1f   : > { %s602_s29 = scalar_lea.vmem %s793_s10, 128  ;;  %s683_s30 = smov [#allocation3]  }
  0x20   : > { %p603_p0 = scmp.ne.s32.totalorder %s793_s10, %s602_s29  ;;  %s607_s5 = sshll.u32 %s683_s30, 4  ;;  %s608_s5 = int_to_ptr.vmem [resolvable:$false] %s607_s5 }
  0x21   : > { %s609_s6 = scalar_lea.vmem %s608_s5, 256  ;;  %p610_p4 = scmp.lt.s32.totalorder %s793_s10, %s608_s5 }
  0x22   : > { %p605_p1 = pnand %p603_p0, %p591_p3  ;;  %p611_p12 = scmp.lt.s32.totalorder %s609_s6, %s602_s29 }
  0x24   : > { %p606_p2 = pneg %p605_p1  ;;  %p612_p11 = por %p611_p12, %p610_p4 }
  0x26   : > { %p613_p6 = pnand %p612_p11, %p606_p2 }
  0x28   : > { %616 = shalt.err (!%p613_p6)
}
  0x29   : > { %536 = dma.hbm_to_vmem [thread:$0]  (!%p789_p13), %s785_s8, 128, %s793_s10, %s163_s12  }
  0x2a   : > { %p914_p9 = scmp.lt.s32.totalorder %s681_s18, 3  ;;  %p915_p7 = scmp.ge.s32.totalorder %s681_s18, 1 }
  0x2c   : > { %p179_p0 = pnand %p915_p7, %p914_p9 }
  0x2d   : > { %s820_s7 = sand.u32 (!%p179_p0), 1, %s673_s16   ;;  %p916_p6 = scmp.ne.s32.totalorder (!%p179_p0), %s910_s26, 0 }
  0x2e   : > { %182 = sbr.rel (%p179_p0) target bundleno = 532 (0x214), region = 36  ;;  %s490_s9 = sshll.u32 (!%p179_p0), %s820_s7, 3 }
  0x2f   : > { %s185_s13 = scalar_lea.sflag (!%p179_p0), [#allocation4], %s820_s7  ;;  %s188_s11 = scalar_lea.vmem (!%p179_p0), [#allocation3], %s490_s9 }
  0x33   : > { %660 = dma.done.wait (%p916_p6), %s185_s13, 128  }
  0x34   : > { %662 = vsyncadd (%p916_p6), %s185_s13, 4294967168  ;;  %vm246_vm0 = vcmask 146432   ;;  %v684_v0 = vmov 0.0   ;;  %v248_v1 = vld [vmem:[%s188_s11] sm:$0xff]  ;;  %s685_s8 = smov 9   ;;  %vm253_vm1 = vcmask 1047624   ;;  %v222_v2 = vlaneseq }
  0x35   : > { %245 = vst [vmem:[#allocation2] sm:$0xff] %v684_v0  ;;  %247 = vst.msk [vmem:[#allocation2 + $0x8] sm:$0xff] %vm246_vm0, %v684_v0  ;;  %508 = vmatprep.subr.mxu0 %v684_v0  ;;  %250 = vrot.lane.b32.xlu0 %v248_v1, %s685_s8  ;;  %vm255_vm2 = vcmask 72704   ;;  %v492_v9 = vld [vmem:[%s905_s3 + $0x1] ss:$2 sm:$0x3] }
  0x36   : > { %v223_v4 = vshrl.u32 %v222_v2, 7  ;;  %s686_s12 = smov 111   ;;  %v220_v12 = vld [vmem:[%s905_s3] ss:$2 sm:$0x3]  ;;  %s687_s22 = smov 119  }
  0x37   : > { %s688_s23 = smov 110   ;;  %s689_s25 = smov 112   ;;  %vm691_vm3 = vmmov 0   ;;  %v693_v19 = vmov 0   ;;  %v214_v20 = vld [vmem:[%s904_s2] sm:$0xff]  ;;  %vm322_vm4 = vcmask 900096  }
  0x38   : > { %v228_v5 = vsub.s32 1, %v223_v4  ;;  %v224_v6 = vsub.s32 0, %v223_v4  ;;  %s690_s29 = smov 118   ;;  %526 = vmatprep.mubr.msk.f32.mxu0 %vm691_vm3, %v684_v0  ;;  %s692_s30 = smov 120   ;;  %587 = vset.pattern.permute.xlu1 %v693_v19  ;;  %vm315_vm5 = vcmask 908288   ;;  %vm308_vm6 = vcmask 916480  }
  0x39   : > { %588 = vset.pattern.permute.xlu0 %v693_v19  ;;  %s694_s5 = smov 126   ;;  %s695_s6 = smov 127   ;;  %vm301_vm7 = vcmask 965632   ;;  %vm294_vm8 = vcmask 973824   ;;  %vm287_vm9 = vcmask 982016   ;;  %vm278_vm10 = vcmask 1031168  }
  0x3a   : > { %v242_v10 = vrot.slane %v492_v9, %v228_v5  ;;  %v238_v11 = vrot.slane %v492_v9, %v224_v6  ;;  %v229_v15 = vrot.slane %v220_v12, %v228_v5  ;;  %v225_v16 = vrot.slane %v220_v12, %v224_v6  ;;  %v213_v45 = vld [vmem:[%s903_s1] sm:$0xff]  ;;  %s495_s10 = sshll.u32 %s743_s19, 7  ;;  %p917_p12 = scmp.ne.s32.totalorder %s911_s27, 0 }
  0x3b   : > { %vm269_vm11 = vcmask 1039360   ;;  %vm325_vm12 = vcmask 588800   ;;  %s696_s19 = smov [#allocation6]  }
  0xa7   : > { %v251_v3 = vpop.permute.xlu0 %250 }
  0xa8   : > { %254 = vst.msk [vmem:[#allocation2] sm:$0xff] %vm253_vm1, %v251_v3 }
  0xa9   : > { %256 = vst.msk [vmem:[#allocation2 + $0x8] sm:$0xff] %vm255_vm2, %v251_v3 }
  0xaf   : > { %v257_v8 = vld [vmem:[#allocation2] sm:$0xff] }
  0xb0   : > { %v258_v7 = vld [vmem:[#allocation2 + $0x8] sm:$0xff]  ;;  %311 = vrot.lane.b32.xlu1 %v257_v8, %s686_s12  ;;  %v261_v14 = vmul.f32 %v257_v8, %v238_v11  ;;  %v839_v18 = vmul.f32 %v257_v8, %v225_v16 }
  0xb1   : > { %313 = vrot.lane.b32.xlu0 %v258_v7, %s686_s12  ;;  %v262_v13 = vmul.f32 %v258_v7, %v242_v10  ;;  %v260_v17 = vmul.f32 %v258_v7, %v229_v15  ;;  %s212_s12 = scalar_lea.vmem [#allocation6], %s490_s9 }
  0xb2   : > { %s414_s14 = sshll.u32 %s212_s12, 4  ;;  %s415_s14 = int_to_ptr.vmem [resolvable:$true] %s414_s14 }
  0xb4   : > { %290 = vrot.lane.b32.xlu1 %v257_v8, %s687_s22 }
  0xb5   : > { %292 = vrot.lane.b32.xlu0 %v258_v7, %s687_s22 }
  0xb8   : > { %320 = vrot.lane.b32.xlu1 %v262_v13, %s688_s23 }
  0xb9   : > { %318 = vrot.lane.b32.xlu0 %v261_v14, %s688_s23  ;;  %s865_s23 = scalar_lea.hbm %s906_s4, %s495_s10 }
  0xbc   : > { %304 = vrot.lane.b32.xlu1 %v839_v18, %s689_s25 }
  0xbd   : > { %306 = vrot.lane.b32.xlu0 %v260_v17, %s689_s25  ;;  %s401_s25 = scalar_lea.sflag [#allocation5], %s820_s7 }
  0xc0   : > { %297 = vrot.lane.b32.xlu1 %v261_v14, %s690_s29 }
  0xc1   : > { %299 = vrot.lane.b32.xlu0 %v262_v13, %s690_s29  ;;  %s617_s29 = scalar_lea.vmem %s415_s14, 128 }
  0xc2   : > { %p618_p11 = scmp.ne.s32.totalorder %s415_s14, %s617_s29 }
  0xc4   : > { %283 = vrot.lane.b32.xlu1 %v839_v18, %s692_s30  ;;  %p619_p13 = pnand %p618_p11, %p917_p12 }
  0xc5   : > { %285 = vrot.lane.b32.xlu0 %v260_v17, %s692_s30  ;;  %s621_s30 = sshll.u32 %s696_s19, 4  ;;  %s622_s30 = int_to_ptr.vmem [resolvable:$false] %s621_s30 }
  0xc6   : > { %p620_p1 = pneg %p619_p13  ;;  %s623_s9 = scalar_lea.vmem %s622_s30, 256 }
  0xc7   : > { %p624_p3 = scmp.lt.s32.totalorder %s415_s14, %s622_s30  ;;  %p625_p5 = scmp.lt.s32.totalorder %s623_s9, %s617_s29 }
  0xc8   : > { %274 = vrot.lane.b32.xlu1 %v261_v14, %s694_s5 }
  0xc9   : > { %276 = vrot.lane.b32.xlu0 %v262_v13, %s694_s5  ;;  %p626_p8 = por %p625_p5, %p624_p3 }
  0xcb   : > { %p627_p10 = pnand %p626_p8, %p620_p1 }
  0xcc   : > { %265 = vrot.lane.b32.xlu1 %v257_v8, %s695_s6 }
  0xcd   : > { %267 = vrot.lane.b32.xlu0 %v258_v7, %s695_s6 }
  0xd0   : > { %217 = vperm.xlu1 %587, %v214_v20  }
 0x122   : > { %v312_v22 = vpop.permute.xlu1 %311 }
 0x123   : > { %v314_v21 = vpop.permute.xlu0 %313 }
 0x124   : > { %v316_v28 = vsel %vm315_vm5, %v312_v22, %v314_v21 }
 0x126   : > { %v291_v24 = vpop.permute.xlu1 %290 }
 0x127   : > { %v293_v23 = vpop.permute.xlu0 %292 }
 0x128   : > { %v295_v35 = vsel %vm294_vm8, %v291_v24, %v293_v23 }
 0x12a   : > { %v321_v25 = vpop.permute.xlu1 %320 }
 0x12b   : > { %v319_v26 = vpop.permute.xlu0 %318 }
 0x12c   : > { %v323_v27 = vsel %vm322_vm4, %v319_v26, %v321_v25 }
 0x12d   : > { %509 = vmatpush3.msra.mxu0 %v323_v27 }
 0x12e   : > { %510 = vmatprep.subr.mxu0 %v684_v0  ;;  %v305_v30 = vpop.permute.xlu1 %304 }
 0x12f   : > { %511 = vmatpush3.msra.mxu0 %v316_v28  ;;  %v307_v29 = vpop.permute.xlu0 %306 }
 0x130   : > { %512 = vmatprep.subr.mxu0 %v684_v0  ;;  %v309_v31 = vsel %vm308_vm6, %v305_v30, %v307_v29 }
 0x131   : > { %513 = vmatpush3.msra.mxu0 %v309_v31 }
 0x132   : > { %514 = vmatprep.subr.mxu0 %v684_v0  ;;  %v298_v33 = vpop.permute.xlu1 %297 }
 0x133   : > { %v300_v32 = vpop.permute.xlu0 %299 }
 0x134   : > { %v302_v34 = vsel %vm301_vm7, %v298_v33, %v300_v32 }
 0x135   : > { %515 = vmatpush3.msra.mxu0 %v302_v34 }
 0x136   : > { %516 = vmatprep.subr.mxu0 %v684_v0  ;;  %v284_v37 = vpop.permute.xlu1 %283 }
 0x137   : > { %v286_v36 = vpop.permute.xlu0 %285  ;;  %517 = vmatpush3.msra.mxu0 %v295_v35 }
 0x138   : > { %518 = vmatprep.subr.mxu0 %v684_v0  ;;  %v288_v38 = vsel %vm287_vm9, %v284_v37, %v286_v36 }
 0x139   : > { %519 = vmatpush3.msra.mxu0 %v288_v38 }
 0x13a   : > { %520 = vmatprep.subr.mxu0 %v684_v0  ;;  %v275_v40 = vpop.permute.xlu1 %274 }
 0x13b   : > { %v277_v39 = vpop.permute.xlu0 %276 }
 0x13c   : > { %v279_v41 = vsel %vm278_vm10, %v275_v40, %v277_v39 }
 0x13d   : > { %521 = vmatpush3.msra.mxu0 %v279_v41 }
 0x13e   : > { %522 = vmatprep.subr.mxu0 %v684_v0  ;;  %v266_v43 = vpop.permute.xlu1 %265 }
 0x13f   : > { %v268_v42 = vpop.permute.xlu0 %267 }
 0x140   : > { %v270_v44 = vsel %vm269_vm11, %v266_v43, %v268_v42 }
 0x141   : > { %523 = vmatpush3.msra.mxu0 %v270_v44 }
 0x142   : > { %524 = vmatprep.subr.mxu0 %v684_v0 }
 0x143   : > { %525 = vmatpush3.msra.mxu0 %v839_v18 }
 0x144   : > { %527 = vmatmul.mubr.msk.f32.vlgmr.msra.gmra.mxu0 %vm325_vm12, %v213_v45 }
 0x14b   : > { %v218_v46 = vpop.permute.xlu1 %217 }
 0x204   : > { %v395_v47 = vpop.f32.mrf.mxu0 }
 0x205   : > { %v396_v48 = vadd.f32 %v395_v47, %v218_v46 }
 0x206   : > { %v528_v49 = vpop.f32.mrf.mxu0 }
 0x207   : > { %399 = vst [vmem:[%s212_s12] sm:$0xff] %v396_v48 }
 0x208   : > { %630 = shalt.err (!%p627_p10)
}
 0x209   : > { %s631_s5 = scalar_lea.hbm %s865_s23, 128  ;;  %s635_s13 = scalar_lea.hbm %s906_s4, 256 }
 0x20a   : > { %p632_p2 = scmp.ne.s32.totalorder %s865_s23, %s631_s5  ;;  %p636_p7 = scmp.lt.s32.totalorder %s865_s23, %s906_s4 }
 0x20b   : > { %p637_p0 = scmp.lt.s32.totalorder %s635_s13, %s631_s5 }
 0x20c   : > { %p633_p4 = pnand %p632_p2, %p917_p12 }
 0x20d   : > { %p638_p6 = por %p637_p0, %p636_p7 }
 0x20e   : > { %p634_p9 = pneg %p633_p4 }
 0x210   : > { %p639_p11 = pnand %p638_p6, %p634_p9 }
 0x212   : > { %642 = shalt.err (!%p639_p11)
}
 0x213   : > { %531 = dma.vmem_to_hbm [thread:$0]  (%p917_p12), %s415_s14, 128, %s865_s23, %s401_s25  }
 0x214 PF: > { %s426_s26 = sand.u32 1, %s669_s15   ;;  %p918_p13 = scmp.ne.s32.totalorder %s912_s28, 0 }
 0x215   : > { %p919_p1 = scmp.ge.s32.totalorder %s681_s18, 2  ;;  %s427_s10 = scalar_lea.sflag [#allocation5], %s426_s26 }
 0x217   : > { %p538_p3 = pnand %p919_p1, %p918_p13 }
 0x219   : > { %p539_p5 = pneg %p538_p3 }
 0x21b   : > { %664 = dma.done.wait (%p539_p5), %s427_s10, 128  }
 0x21c   : > { %666 = vsyncadd (%p539_p5), %s427_s10, 4294967168  ;;  %p17_p8 = scmp.ge.s32.totalorder %s747_s21, 4   ;;  %s920_s15 = smov %s673_s16 }
 0x21d   : > { %s921_s16 = smov %s677_s17  ;;  %s922_s17 = smov %s759_s24 }
 0x21e   : > { %s923_s18 = smov %s747_s21  ;;  %19 = sbr.rel (!%p17_p8) target bundleno = 5 (0x5), region = 82 }
 0x223   :  { %432 = vsyncpa [#allocation4], 1 }
 0x224   :  { %434 = vsyncpa [#allocation4 + $0x1], 1 }
 0x225   :  { %435 = vsyncpa [#allocation5], 1 }
 0x226   :  { %437 = vsyncpa [#allocation5 + $0x1], 1 }

</bundles_post_ra>
